<compile_context>
chip_gen: v5e
topology: v5e:2x2
jax: 0.10.0
libtpu: 0.0.40
codegen_flags: <defaults>
</compile_context>

<pallas_src>
import functools
import itertools

import numpy as np
import jax
import jax.numpy as jnp
from jax.experimental import pallas as pl
from jax.experimental.pallas import tpu as pltpu

try:  # prefer scipy's Hungarian solver if available
    from scipy.optimize import linear_sum_assignment as _scipy_lsa
except Exception:  # pragma: no cover
    _scipy_lsa = None

_EPS = 1e-7
_NEG_INF = -1e30


def _round_up(x, m):
    return ((x + m - 1) // m) * m


def _choose_row_tiling(N, Q, T_pad):
    """Pick (Q_pad, tm) so that the grid has >=2 steps when possible (v7x TC
    sharding), padded-row waste is small, and the (tm, T_pad) working set
    stays comfortably inside scoped VMEM (also safe for v7x's 64 MiB)."""
    tm_cap = 512
    while tm_cap > 8 and tm_cap * T_pad * 4 * 10 > (24 << 20):
        tm_cap //= 2

    Q8 = _round_up(max(Q, 8), 8)
    if Q8 <= tm_cap:
        if N >= 2 or Q8 < 16:
            return Q8, Q8                      # batch grid axis supplies >=2 steps
        tm = _round_up((Q8 + 1) // 2, 8)       # N == 1: give each v7x TC a tile
        return 2 * tm, tm

    # large Q: pick tm minimizing padded rows (ties -> larger tile)
    best = None
    for tm in (tm_cap, max(tm_cap // 2, 8), max(tm_cap // 4, 8)):
        qp = _round_up(Q, tm)
        waste = qp - Q
        if best is None or waste < best[2]:
            best = (qp, tm, waste)
    return best[0], best[1]


# --------------------------------------------------------------------------
# Pallas kernel: one (tm, T_pad) tile of batch b's cost block.
#   cls_ref   : (tm, C_pad)    f32  class logits; padding lanes, the sigmoid
#                                   lane and padded query rows hold -1e30
#   oh_ref    : (C_pad, T_pad) f32  one-hot(tgt_ids) pre-scaled by -lambda_cls
#   rinfo_ref : (tm, 16)       f32  [L1*cx, L1*cy, L1*w, L1*h, x0,y0,x1,y1,
#                                    area, -lambda_cls*sigmoid(last logit), 0...]
#   tinfo_ref : (16, T_pad)    f32  [L1*cx, L1*cy, L1*w, L1*h, x0,y0,x1,y1,
#                                    area, noobj_flag, 0...]
#   cost_ref  : (tm, T_pad)    f32  weighted pairwise cost
# --------------------------------------------------------------------------
def _make_cost_kernel(lambda_iou, l1_nonneg):
    lambda_iou = float(lambda_iou)

    def kernel(cls_ref, oh_ref, rinfo_ref, tinfo_ref, cost_ref):
        # ---- class path (no iota/select, no full-tile sigmoid) --------------
        cls_logits = cls_ref[...]                               # (tm, C_pad)
        m = jnp.max(cls_logits, axis=-1, keepdims=True)
        e = jnp.exp(cls_logits - m)                             # pad lanes -> 0
        denom = jnp.sum(e, axis=-1, keepdims=True)
        sm = e * (1.0 / denom)             # exact reciprocal on a (tm,1) slice

        # -lambda_cls * softmax[:, tgt_ids] via f32 one-hot MXU matmul
        cls_cost = jnp.dot(sm, oh_ref[...],
                           preferred_element_type=jnp.float32)  # (tm, T_pad)

        # ---- per-row (pred) info, precomputed in the wrapper -----------------
        ri = rinfo_ref[...]                                     # (tm, 16)
        scx, scy = ri[:, 0:1], ri[:, 1:2]      # |lambda_L1|-scaled cxcywh
        sw, sh = ri[:, 2:3], ri[:, 3:4]
        ox0, oy0 = ri[:, 4:5], ri[:, 5:6]      # unscaled xyxy corners
        ox1, oy1 = ri[:, 6:7], ri[:, 7:8]
        area_o = ri[:, 8:9]
        noobj_cost = ri[:, 9:10]               # -lambda_cls * sigmoid(last logit)

        # ---- per-target info, precomputed in the wrapper ---------------------
        ti = tinfo_ref[...]                                     # (16, T_pad)
        tscx, tscy, tsw, tsh = ti[0:1], ti[1:2], ti[2:3], ti[3:4]
        tx0, ty0, tx1, ty1 = ti[4:5], ti[5:6], ti[6:7], ti[7:8]
        area_t = ti[8:9]
        noobj = ti[9:10]                       # 1.0 where label == num_classes

        # ---- lambda_L1 * pairwise L1 (coords pre-scaled in the wrapper) ------
        cost_bbox = (jnp.abs(scx - tscx) + jnp.abs(scy - tscy)
                     + jnp.abs(sw - tsw) + jnp.abs(sh - tsh))   # (tm, T_pad)
        l1_term = cost_bbox if l1_nonneg else -cost_bbox

        # ---- GIoU (approx reciprocals -> EUP slot) ---------------------------
        iw = jnp.maximum(jnp.minimum(ox1, tx1) - jnp.maximum(ox0, tx0), 0.0)
        ih = jnp.maximum(jnp.minimum(oy1, ty1) - jnp.maximum(oy0, ty0), 0.0)
        inter = iw * ih
        union = area_o + area_t - inter
        inv_union = pl.reciprocal(jnp.maximum(union, _EPS), approx=True)
        iou = inter * inv_union
        # enclosing-box extents are >= 0 for valid boxes; clamp not needed.
        ew = jnp.maximum(ox1, tx1) - jnp.minimum(ox0, tx0)
        eh = jnp.maximum(oy1, ty1) - jnp.minimum(oy0, ty0)
        area_e = ew * eh
        inv_e = pl.reciprocal(jnp.maximum(area_e, _EPS), approx=True)
        giou = iou - (area_e - union) * inv_e

        # ---- single-pass combine ---------------------------------------------
        cost_ref[...] = (l1_term + cls_cost + noobj_cost * noobj
                         - lambda_iou * giou)

    return kernel


# --------------------------------------------------------------------------
# Jitted wrapper: per-batch padding, operand precompute, pallas_call.
# Returns the block-diagonal cost as (N, Q, T_pad); per-batch blocks are
# cost[b, :, :T_b].
# --------------------------------------------------------------------------
@functools.partial(jax.jit,
                   static_argnames=("lambda_cls", "lambda_iou", "lambda_L1"))
def _compute_cost(logits, boxes, tgt_labels, tgt_boxes, scale,
                  *, lambda_cls, lambda_iou, lambda_L1):
    N, Q, C1 = logits.shape
    num_cls = C1 - 1
    T_pad = tgt_labels.shape[1]                 # already padded to >=128
    C_pad = max(128, _round_up(C1, 128))

    Q_pad, tm = _choose_row_tiling(N, Q, T_pad)

    # ---- class logits: real classes in lanes [0, num_cls); everything else
    # (class padding + padded query rows; the sigmoid logit is dropped here)
    # is -1e30 so exp() contributes 0 and no in-kernel masking is needed.
    cls = logits[..., :num_cls].astype(jnp.float32)                 # (N,Q,C)
    cls_pad = jnp.pad(cls, ((0, 0), (0, Q_pad - Q), (0, C_pad - num_cls)),
                      constant_values=_NEG_INF)

    # ---- one-hot gather operand, pre-scaled by -lambda_cls (f32: MXU has
    # slack; keeps parity tight). Padded targets have label -1 -> zero column.
    oh = jax.nn.one_hot(tgt_labels, C_pad, dtype=jnp.float32)       # (N,T_pad,C_pad)
    oh = jnp.swapaxes(oh, 1, 2) * jnp.float32(-lambda_cls)          # (N,C_pad,T_pad)

    # ---- per-query info block: |lambda_L1|-scaled cxcywh, xyxy corners, area,
    # and the "no-object" class cost column (-lambda_cls * sigmoid(last logit)).
    lL1 = jnp.float32(abs(lambda_L1))
    ob = boxes.astype(jnp.float32)                                  # (N,Q,4)
    ocx, ocy, ow, ohh = ob[..., 0], ob[..., 1], ob[..., 2], ob[..., 3]
    ox0, oy0 = ocx - 0.5 * ow, ocy - 0.5 * ohh
    ox1, oy1 = ocx + 0.5 * ow, ocy + 0.5 * ohh
    area_o = (ox1 - ox0) * (oy1 - oy0)
    sig = jax.nn.sigmoid(logits[..., num_cls].astype(jnp.float32))  # (N,Q)
    rinfo = jnp.stack([lL1 * ocx, lL1 * ocy, lL1 * ow, lL1 * ohh,
                       ox0, oy0, ox1, oy1, area_o,
                       jnp.float32(-lambda_cls) * sig], axis=-1)    # (N,Q,10)
    rinfo = jnp.pad(rinfo, ((0, 0), (0, Q_pad - Q), (0, 6)))        # (N,Q_pad,16)

    # ---- per-target info block: normalized cxcywh (scaled), xyxy, area,
    # no-object flag. Padded targets are all-zero columns (sliced away later).
    tb = tgt_boxes.astype(jnp.float32) / scale                      # (N,T_pad,4)
    tcx, tcy, tw, th = tb[..., 0], tb[..., 1], tb[..., 2], tb[..., 3]
    tx0, ty0 = tcx - 0.5 * tw, tcy - 0.5 * th
    tx1, ty1 = tcx + 0.5 * tw, tcy + 0.5 * th
    area_t = (tx1 - tx0) * (ty1 - ty0)
    noobj = (tgt_labels == num_cls).astype(jnp.float32)
    tinfo = jnp.stack([lL1 * tcx, lL1 * tcy, lL1 * tw, lL1 * th,
                       tx0, ty0, tx1, ty1, area_t, noobj], axis=1)  # (N,10,T_pad)
    tinfo = jnp.pad(tinfo, ((0, 0), (0, 6), (0, 0)))                # (N,16,T_pad)

    kernel = _make_cost_kernel(lambda_iou, lambda_L1 >= 0.0)

    cost = pl.pallas_call(
        kernel,
        out_shape=jax.ShapeDtypeStruct((N, Q_pad, T_pad), jnp.float32),
        grid=(N, Q_pad // tm),
        in_specs=[
            pl.BlockSpec((None, tm, C_pad), lambda b, i: (b, i, 0)),
            pl.BlockSpec((None, C_pad, T_pad), lambda b, i: (b, 0, 0)),
            pl.BlockSpec((None, tm, 16), lambda b, i: (b, i, 0)),
            pl.BlockSpec((None, 16, T_pad), lambda b, i: (b, 0, 0)),
        ],
        out_specs=pl.BlockSpec((None, tm, T_pad), lambda b, i: (b, i, 0)),
        compiler_params=pltpu.CompilerParams(
            dimension_semantics=("parallel", "parallel")),
    )(cls_pad, oh, rinfo, tinfo)

    return cost[:, :Q, :]                                           # (N,Q,T_pad)


# --------------------------------------------------------------------------
# Host-side exact assignment.
# TODO(synk): scipy-style linear_sum_assignment (Hungarian) is a sequential
# combinatorial algorithm with no clean Pallas equivalent; kept on host.
# --------------------------------------------------------------------------
def _linear_sum_assignment(cost):
    cost = np.asarray(cost)
    if _scipy_lsa is not None:
        return _scipy_lsa(cost)
    Q, T = cost.shape
    if T == 0:
        return np.zeros((0,), np.int64), np.zeros((0,), np.int64)
    if T > 9:
        raise NotImplementedError(
            "scipy not available; brute-force fallback only supports T <= 9")
    best_rows, best_val = None, np.inf
    cols = list(range(T))
    for rows in itertools.permutations(range(Q), T):
        v = cost[list(rows), cols].sum()
        if v < best_val:
            best_val, best_rows = v, rows
    row = np.asarray(best_rows)
    col = np.arange(T)
    order = np.argsort(row)
    return row[order], col[order]


class HungarianMatcher:
    def __init__(self, lambda_cls, lambda_iou, lambda_L1):
        self.lambda_cls = float(lambda_cls)
        self.lambda_iou = float(lambda_iou)
        self.lambda_L1 = float(lambda_L1)

    def pairwise_cost(self, outputs, targets, size):
        """Block-diagonal pairwise cost; returns ((N, Q, T_pad) np array, sizes)."""
        logits = jnp.asarray(outputs['pred_logits'])   # (N, Q, C+1)
        boxes = jnp.asarray(outputs['pred_boxes'])     # (N, Q, 4) cxcywh in [0,1]
        N = logits.shape[0]

        sizes = [int(t['boxes'].shape[0]) for t in targets]
        T_pad = max(128, _round_up(max(sizes + [1]), 128))

        labels_np = np.full((N, T_pad), -1, np.int32)       # -1 -> zero one-hot col
        boxes_np = np.zeros((N, T_pad, 4), np.float32)
        for b, t in enumerate(targets):
            s = sizes[b]
            if s:
                labels_np[b, :s] = np.asarray(t['labels'], dtype=np.int32)
                boxes_np[b, :s] = np.asarray(t['boxes'], dtype=np.float32)

        # bbox_normalize: absolute cxcywh -> normalized by (w, h, w, h)
        h, w = size
        scale = jnp.array([w, h, w, h], dtype=jnp.float32)

        cost = _compute_cost(logits, boxes,
                             jnp.asarray(labels_np), jnp.asarray(boxes_np),
                             scale,
                             lambda_cls=self.lambda_cls,
                             lambda_iou=self.lambda_iou,
                             lambda_L1=self.lambda_L1)
        cost_np = np.asarray(jax.block_until_ready(cost))   # (N, Q, T_pad)
        return cost_np, sizes

    def __call__(self, outputs, targets, size):
        cost_np, sizes = self.pairwise_cost(outputs, targets, size)
        indices = []
        for b, s in enumerate(sizes):
            indices.append(_linear_sum_assignment(cost_np[b, :, :s]))
        return [(i, j) for i, j in indices]


# --------------------------------------------------------------------------
# Pure numpy reference of one batch's cost block (correctness check).
# --------------------------------------------------------------------------
def _reference_cost_block(logits, boxes, labels, tboxes_norm, lc, li, ll):
    logits, boxes, tboxes_norm = map(np.asarray, (logits, boxes, tboxes_norm))
    labels = np.asarray(labels)
    cls = logits[:, :-1]
    e = np.exp(cls - cls.max(-1, keepdims=True))
    sm = e / e.sum(-1, keepdims=True)
    sig = 1.0 / (1.0 + np.exp(-logits[:, -1:]))
    prob = np.concatenate([sm, sig], -1)
    cost_class = -prob[:, labels]
    cost_bbox = np.abs(boxes[:, None, :] - tboxes_norm[None, :, :]).sum(-1)

    def xyxy(b):
        cx, cy, w, h = b[..., 0], b[..., 1], b[..., 2], b[..., 3]
        return np.stack([cx - 0.5 * w, cy - 0.5 * h, cx + 0.5 * w, cy + 0.5 * h], -1)

    o, t = xyxy(boxes), xyxy(tboxes_norm)
    ao = (o[:, 2] - o[:, 0]) * (o[:, 3] - o[:, 1])
    at = (t[:, 2] - t[:, 0]) * (t[:, 3] - t[:, 1])
    lt = np.maximum(o[:, None, :2], t[None, :, :2])
    rb = np.minimum(o[:, None, 2:], t[None, :, 2:])
    wh = np.clip(rb - lt, 0, None)
    inter = wh[..., 0] * wh[..., 1]
    union = ao[:, None] + at[None, :] - inter
    iou = inter / union
    lte = np.minimum(o[:, None, :2], t[None, :, :2])
    rbe = np.maximum(o[:, None, 2:], t[None, :, 2:])
    whe = np.clip(rbe - lte, 0, None)
    ae = whe[..., 0] * whe[..., 1]
    giou = iou - (ae - union) / ae
    return ll * cost_bbox + lc * cost_class + li * (-giou)


if __name__ == "__main__":
    key = jax.random.PRNGKey(0)
    N, Q, num_classes = 2, 8, 4          # pred_logits: (N, Q, num_classes + 1)
    H, W = 480.0, 640.0

    k1, k2, k3, k4 = jax.random.split(key, 4)
    pred_logits = jax.random.normal(k1, (N, Q, num_classes + 1), jnp.float32)
    pred_boxes = jax.nn.sigmoid(jax.random.normal(k2, (N, Q, 4), jnp.float32))

    # targets: batch 0 has 3 boxes, batch 1 has 4 boxes (absolute cxcywh).
    sizes = [3, 4]
    targets = []
    for b, (s, kk) in enumerate(zip(sizes, [k3, k4])):
        ka, kb, kc = jax.random.split(kk, 3)
        cxcy = jax.random.uniform(ka, (s, 2), jnp.float32, minval=50.0, maxval=400.0)
        wh = jax.random.uniform(kb, (s, 2), jnp.float32, minval=20.0, maxval=120.0)
        labels = jax.random.randint(kc, (s,), 0, num_classes + 1)
        targets.append({'labels': labels,
                        'boxes': jnp.concatenate([cxcy, wh], axis=-1)})

    matcher = HungarianMatcher(lambda_cls=1.0, lambda_iou=2.0, lambda_L1=5.0)
    outputs = {'pred_logits': pred_logits, 'pred_boxes': pred_boxes}

    cost_np, tsizes = matcher.pairwise_cost(outputs, targets, size=(H, W))
    indices = matcher(outputs, targets, size=(H, W))

    # --- per-batch check against a pure-numpy reference of the cost block
    scale_np = np.array([W, H, W, H], np.float32)
    for b in range(N):
        s = tsizes[b]
        ref = _reference_cost_block(np.asarray(pred_logits[b]),
                                    np.asarray(pred_boxes[b]),
                                    np.asarray(targets[b]['labels']),
                                    np.asarray(targets[b]['boxes']) / scale_np,
                                    lc=1.0, li=2.0, ll=5.0)
        got = cost_np[b, :, :s]
        # class/L1 paths are near-exact; tolerance covers the approx EUP
        # reciprocals in the IoU/GIoU path only.
        np.testing.assert_allclose(got, ref, rtol=2e-3, atol=1e-2)

        # assignment sanity: kernel-derived assignment must be (near-)optimal
        # on the reference cost as well.
        ri, ci = indices[b]
        ro, co = _linear_sum_assignment(ref)
        assert len(ri) == s and len(set(np.asarray(ci).tolist())) == s
        assert ref[np.asarray(ri), np.asarray(ci)].sum() \
            <= ref[np.asarray(ro), np.asarray(co)].sum() + 0.1

    jax.block_until_ready(jnp.zeros(()))
    print("KERNEL_OK")
</pallas_src>

<mosaic_0001>
module attributes {stable_mosaic.version = 11 : i64} {
  func.func @kernel(%arg0: i32, %arg1: i32, %arg2: memref<1x8x128xf32, #tpu.memory_space<vmem>>, %arg3: memref<1x128x128xf32, #tpu.memory_space<vmem>>, %arg4: memref<1x8x16xf32, #tpu.memory_space<vmem>>, %arg5: memref<1x16x128xf32, #tpu.memory_space<vmem>>, %arg6: memref<1x8x128xf32, #tpu.memory_space<vmem>>) attributes {dimension_semantics = [#tpu.dimension_semantics<parallel>, #tpu.dimension_semantics<parallel>], iteration_bounds = array<i64: 2, 1>, scalar_prefetch = 0 : i64, scratch_operands = 0 : i64, tpu.core_type = #tpu.core_type<tc>, window_params = [{transform_indices = @transform_0, window_bounds = array<i64: 1, 8, 128>}, {transform_indices = @transform_1, window_bounds = array<i64: 1, 128, 128>}, {transform_indices = @transform_2, window_bounds = array<i64: 1, 8, 16>}, {transform_indices = @transform_3, window_bounds = array<i64: 1, 16, 128>}, {transform_indices = @transform_4, window_bounds = array<i64: 1, 8, 128>}]} {
    %c0 = arith.constant 0 : index
    %c0_0 = arith.constant 0 : index
    %c0_1 = arith.constant 0 : index
    %0 = vector.load %arg2[%c0, %c0_0, %c0_1] : memref<1x8x128xf32, #tpu.memory_space<vmem>>, vector<1x8x128xf32>
    %1 = vector.shape_cast %0 : vector<1x8x128xf32> to vector<8x128xf32>
    %cst = arith.constant dense<0xFF800000> : vector<8xf32>
    %2 = vector.multi_reduction <maximumf>, %1, %cst [1] : vector<8x128xf32> to vector<8xf32>
    %3 = vector.shape_cast %2 : vector<8xf32> to vector<8x1xf32>
    %4 = vector.broadcast %3 : vector<8x1xf32> to vector<8x128xf32>
    %5 = arith.subf %1, %4 : vector<8x128xf32>
    %6 = math.exp %5 : vector<8x128xf32>
    %cst_2 = arith.constant dense<0.000000e+00> : vector<8xf32>
    %7 = vector.multi_reduction <add>, %6, %cst_2 [1] : vector<8x128xf32> to vector<8xf32>
    %8 = vector.shape_cast %7 : vector<8xf32> to vector<8x1xf32>
    %cst_3 = arith.constant 1.000000e+00 : f32
    %9 = vector.broadcast %cst_3 : f32 to vector<8x1xf32>
    %10 = arith.divf %9, %8 : vector<8x1xf32>
    %11 = vector.broadcast %10 : vector<8x1xf32> to vector<8x128xf32>
    %12 = arith.mulf %6, %11 : vector<8x128xf32>
    %c0_4 = arith.constant 0 : index
    %c0_5 = arith.constant 0 : index
    %c0_6 = arith.constant 0 : index
    %13 = vector.load %arg3[%c0_4, %c0_5, %c0_6] : memref<1x128x128xf32, #tpu.memory_space<vmem>>, vector<1x128x128xf32>
    %14 = vector.shape_cast %13 : vector<1x128x128xf32> to vector<128x128xf32>
    %cst_7 = arith.constant dense<0.000000e+00> : vector<8x128xf32>
    %15 = tpu.matmul %12, %14, %cst_7 {dimension_numbers = #tpu.dot_dimension_numbers<[1], [0], [0], [1], [0, 0, 1, 1], [], []>} : vector<8x128xf32>, vector<128x128xf32>, vector<8x128xf32> -> vector<8x128xf32>
    %c0_8 = arith.constant 0 : index
    %c0_9 = arith.constant 0 : index
    %c0_10 = arith.constant 0 : index
    %16 = vector.load %arg4[%c0_8, %c0_9, %c0_10] : memref<1x8x16xf32, #tpu.memory_space<vmem>>, vector<1x8x16xf32>
    %17 = vector.shape_cast %16 : vector<1x8x16xf32> to vector<8x16xf32>
    %18 = vector.extract_strided_slice %17 {offsets = [0, 0], sizes = [8, 1], strides = [1, 1]} : vector<8x16xf32> to vector<8x1xf32>
    %19 = vector.extract_strided_slice %17 {offsets = [0, 1], sizes = [8, 1], strides = [1, 1]} : vector<8x16xf32> to vector<8x1xf32>
    %20 = vector.extract_strided_slice %17 {offsets = [0, 2], sizes = [8, 1], strides = [1, 1]} : vector<8x16xf32> to vector<8x1xf32>
    %21 = vector.extract_strided_slice %17 {offsets = [0, 3], sizes = [8, 1], strides = [1, 1]} : vector<8x16xf32> to vector<8x1xf32>
    %22 = vector.extract_strided_slice %17 {offsets = [0, 4], sizes = [8, 1], strides = [1, 1]} : vector<8x16xf32> to vector<8x1xf32>
    %23 = vector.extract_strided_slice %17 {offsets = [0, 5], sizes = [8, 1], strides = [1, 1]} : vector<8x16xf32> to vector<8x1xf32>
    %24 = vector.extract_strided_slice %17 {offsets = [0, 6], sizes = [8, 1], strides = [1, 1]} : vector<8x16xf32> to vector<8x1xf32>
    %25 = vector.extract_strided_slice %17 {offsets = [0, 7], sizes = [8, 1], strides = [1, 1]} : vector<8x16xf32> to vector<8x1xf32>
    %26 = vector.extract_strided_slice %17 {offsets = [0, 8], sizes = [8, 1], strides = [1, 1]} : vector<8x16xf32> to vector<8x1xf32>
    %27 = vector.extract_strided_slice %17 {offsets = [0, 9], sizes = [8, 1], strides = [1, 1]} : vector<8x16xf32> to vector<8x1xf32>
    %c0_11 = arith.constant 0 : index
    %c0_12 = arith.constant 0 : index
    %c0_13 = arith.constant 0 : index
    %28 = vector.load %arg5[%c0_11, %c0_12, %c0_13] : memref<1x16x128xf32, #tpu.memory_space<vmem>>, vector<1x16x128xf32>
    %29 = vector.shape_cast %28 : vector<1x16x128xf32> to vector<16x128xf32>
    %30 = vector.extract_strided_slice %29 {offsets = [0, 0], sizes = [1, 128], strides = [1, 1]} : vector<16x128xf32> to vector<1x128xf32>
    %31 = vector.extract_strided_slice %29 {offsets = [1, 0], sizes = [1, 128], strides = [1, 1]} : vector<16x128xf32> to vector<1x128xf32>
    %32 = vector.extract_strided_slice %29 {offsets = [2, 0], sizes = [1, 128], strides = [1, 1]} : vector<16x128xf32> to vector<1x128xf32>
    %33 = vector.extract_strided_slice %29 {offsets = [3, 0], sizes = [1, 128], strides = [1, 1]} : vector<16x128xf32> to vector<1x128xf32>
    %34 = vector.extract_strided_slice %29 {offsets = [4, 0], sizes = [1, 128], strides = [1, 1]} : vector<16x128xf32> to vector<1x128xf32>
    %35 = vector.extract_strided_slice %29 {offsets = [5, 0], sizes = [1, 128], strides = [1, 1]} : vector<16x128xf32> to vector<1x128xf32>
    %36 = vector.extract_strided_slice %29 {offsets = [6, 0], sizes = [1, 128], strides = [1, 1]} : vector<16x128xf32> to vector<1x128xf32>
    %37 = vector.extract_strided_slice %29 {offsets = [7, 0], sizes = [1, 128], strides = [1, 1]} : vector<16x128xf32> to vector<1x128xf32>
    %38 = vector.extract_strided_slice %29 {offsets = [8, 0], sizes = [1, 128], strides = [1, 1]} : vector<16x128xf32> to vector<1x128xf32>
    %39 = vector.extract_strided_slice %29 {offsets = [9, 0], sizes = [1, 128], strides = [1, 1]} : vector<16x128xf32> to vector<1x128xf32>
    %40 = vector.broadcast %18 : vector<8x1xf32> to vector<8x128xf32>
    %41 = vector.broadcast %30 : vector<1x128xf32> to vector<8x128xf32>
    %42 = arith.subf %40, %41 : vector<8x128xf32>
    %43 = math.absf %42 : vector<8x128xf32>
    %44 = vector.broadcast %19 : vector<8x1xf32> to vector<8x128xf32>
    %45 = vector.broadcast %31 : vector<1x128xf32> to vector<8x128xf32>
    %46 = arith.subf %44, %45 : vector<8x128xf32>
    %47 = math.absf %46 : vector<8x128xf32>
    %48 = arith.addf %43, %47 : vector<8x128xf32>
    %49 = vector.broadcast %20 : vector<8x1xf32> to vector<8x128xf32>
    %50 = vector.broadcast %32 : vector<1x128xf32> to vector<8x128xf32>
    %51 = arith.subf %49, %50 : vector<8x128xf32>
    %52 = math.absf %51 : vector<8x128xf32>
    %53 = arith.addf %48, %52 : vector<8x128xf32>
    %54 = vector.broadcast %21 : vector<8x1xf32> to vector<8x128xf32>
    %55 = vector.broadcast %33 : vector<1x128xf32> to vector<8x128xf32>
    %56 = arith.subf %54, %55 : vector<8x128xf32>
    %57 = math.absf %56 : vector<8x128xf32>
    %58 = arith.addf %53, %57 : vector<8x128xf32>
    %59 = vector.broadcast %24 : vector<8x1xf32> to vector<8x128xf32>
    %60 = vector.broadcast %36 : vector<1x128xf32> to vector<8x128xf32>
    %61 = arith.minimumf %59, %60 : vector<8x128xf32>
    %62 = vector.broadcast %22 : vector<8x1xf32> to vector<8x128xf32>
    %63 = vector.broadcast %34 : vector<1x128xf32> to vector<8x128xf32>
    %64 = arith.maximumf %62, %63 : vector<8x128xf32>
    %65 = arith.subf %61, %64 : vector<8x128xf32>
    %cst_14 = arith.constant 0.000000e+00 : f32
    %66 = vector.broadcast %cst_14 : f32 to vector<8x128xf32>
    %67 = arith.maximumf %65, %66 : vector<8x128xf32>
    %68 = vector.broadcast %25 : vector<8x1xf32> to vector<8x128xf32>
    %69 = vector.broadcast %37 : vector<1x128xf32> to vector<8x128xf32>
    %70 = arith.minimumf %68, %69 : vector<8x128xf32>
    %71 = vector.broadcast %23 : vector<8x1xf32> to vector<8x128xf32>
    %72 = vector.broadcast %35 : vector<1x128xf32> to vector<8x128xf32>
    %73 = arith.maximumf %71, %72 : vector<8x128xf32>
    %74 = arith.subf %70, %73 : vector<8x128xf32>
    %cst_15 = arith.constant 0.000000e+00 : f32
    %75 = vector.broadcast %cst_15 : f32 to vector<8x128xf32>
    %76 = arith.maximumf %74, %75 : vector<8x128xf32>
    %77 = arith.mulf %67, %76 : vector<8x128xf32>
    %78 = vector.broadcast %26 : vector<8x1xf32> to vector<8x128xf32>
    %79 = vector.broadcast %38 : vector<1x128xf32> to vector<8x128xf32>
    %80 = arith.addf %78, %79 : vector<8x128xf32>
    %81 = arith.subf %80, %77 : vector<8x128xf32>
    %cst_16 = arith.constant 1.000000e-07 : f32
    %82 = vector.broadcast %cst_16 : f32 to vector<8x128xf32>
    %83 = arith.maximumf %81, %82 : vector<8x128xf32>
    %84 = tpu.reciprocal %83 {approx = true} : vector<8x128xf32> -> vector<8x128xf32>
    %85 = arith.mulf %77, %84 : vector<8x128xf32>
    %86 = vector.broadcast %24 : vector<8x1xf32> to vector<8x128xf32>
    %87 = vector.broadcast %36 : vector<1x128xf32> to vector<8x128xf32>
    %88 = arith.maximumf %86, %87 : vector<8x128xf32>
    %89 = vector.broadcast %22 : vector<8x1xf32> to vector<8x128xf32>
    %90 = vector.broadcast %34 : vector<1x128xf32> to vector<8x128xf32>
    %91 = arith.minimumf %89, %90 : vector<8x128xf32>
    %92 = arith.subf %88, %91 : vector<8x128xf32>
    %93 = vector.broadcast %25 : vector<8x1xf32> to vector<8x128xf32>
    %94 = vector.broadcast %37 : vector<1x128xf32> to vector<8x128xf32>
    %95 = arith.maximumf %93, %94 : vector<8x128xf32>
    %96 = vector.broadcast %23 : vector<8x1xf32> to vector<8x128xf32>
    %97 = vector.broadcast %35 : vector<1x128xf32> to vector<8x128xf32>
    %98 = arith.minimumf %96, %97 : vector<8x128xf32>
    %99 = arith.subf %95, %98 : vector<8x128xf32>
    %100 = arith.mulf %92, %99 : vector<8x128xf32>
    %cst_17 = arith.constant 1.000000e-07 : f32
    %101 = vector.broadcast %cst_17 : f32 to vector<8x128xf32>
    %102 = arith.maximumf %100, %101 : vector<8x128xf32>
    %103 = tpu.reciprocal %102 {approx = true} : vector<8x128xf32> -> vector<8x128xf32>
    %104 = arith.subf %100, %81 : vector<8x128xf32>
    %105 = arith.mulf %104, %103 : vector<8x128xf32>
    %106 = arith.subf %85, %105 : vector<8x128xf32>
    %107 = arith.addf %58, %15 : vector<8x128xf32>
    %108 = vector.broadcast %27 : vector<8x1xf32> to vector<8x128xf32>
    %109 = vector.broadcast %39 : vector<1x128xf32> to vector<8x128xf32>
    %110 = arith.mulf %108, %109 : vector<8x128xf32>
    %111 = arith.addf %107, %110 : vector<8x128xf32>
    %cst_18 = arith.constant 2.000000e+00 : f32
    %112 = vector.broadcast %cst_18 : f32 to vector<8x128xf32>
    %113 = arith.mulf %112, %106 : vector<8x128xf32>
    %114 = arith.subf %111, %113 : vector<8x128xf32>
    %c0_19 = arith.constant 0 : index
    %c0_20 = arith.constant 0 : index
    %c0_21 = arith.constant 0 : index
    %115 = vector.load %arg6[%c0_19, %c0_20, %c0_21] : memref<1x8x128xf32, #tpu.memory_space<vmem>>, vector<1x8x128xf32>
    %116 = vector.shape_cast %115 : vector<1x8x128xf32> to vector<8x128xf32>
    %117 = vector.shape_cast %114 : vector<8x128xf32> to vector<1x8x128xf32>
    tpu.vector_store %arg6[%c0_19, %c0_20, %c0_21], %117 {strides = array<i32>} : memref<1x8x128xf32, #tpu.memory_space<vmem>>, vector<1x8x128xf32>,
    return
  }
  func.func @transform_0(%arg0: i32, %arg1: i32) -> (i32, i32, i32) {
    %c0_i32 = arith.constant 0 : i32
    %c0_i32_0 = arith.constant 0 : i32
    return %arg0, %arg1, %c0_i32 : i32, i32, i32
  }
  func.func @transform_1(%arg0: i32, %arg1: i32) -> (i32, i32, i32) {
    %c0_i32 = arith.constant 0 : i32
    %c0_i32_0 = arith.constant 0 : i32
    %c0_i32_1 = arith.constant 0 : i32
    return %arg0, %c0_i32, %c0_i32_0 : i32, i32, i32
  }
  func.func @transform_2(%arg0: i32, %arg1: i32) -> (i32, i32, i32) {
    %c0_i32 = arith.constant 0 : i32
    %c0_i32_0 = arith.constant 0 : i32
    return %arg0, %arg1, %c0_i32 : i32, i32, i32
  }
  func.func @transform_3(%arg0: i32, %arg1: i32) -> (i32, i32, i32) {
    %c0_i32 = arith.constant 0 : i32
    %c0_i32_0 = arith.constant 0 : i32
    %c0_i32_1 = arith.constant 0 : i32
    return %arg0, %c0_i32, %c0_i32_0 : i32, i32, i32
  }
  func.func @transform_4(%arg0: i32, %arg1: i32) -> (i32, i32, i32) {
    %c0_i32 = arith.constant 0 : i32
    %c0_i32_0 = arith.constant 0 : i32
    return %arg0, %arg1, %c0_i32 : i32, i32, i32
  }
}

</mosaic_0001>

<bundles_post_ra>
// kernel: _compute_cost.1
= control target key start
LH: loop header
LB: loop body
LE: loop exit
PB: predicated region body
PF: predicated region fallthrough
CT: control target
= control target key end

     0   :  { %9 = vsyncpa [#allocation3], 0  ;;  %s928_s0 = inlined_call_operand.vmem [shape: f32[2,8,128], index: 0, kind: input, shape index: {}]   ;;  %s929_s1 = inlined_call_operand.vmem [shape: f32[2,128,128], index: 1, kind: input, shape index: {}]   ;;  %s930_s2 = inlined_call_operand.vmem [shape: f32[2,8,16], index: 2, kind: input, shape index: {}]   ;;  %s931_s3 = inlined_call_operand.vmem [shape: f32[2,16,128], index: 3, kind: input, shape index: {}]   ;;  %s932_s4 = inlined_call_operand.hbm [shape: f32[2,8,128], index: 4, kind: output, shape index: {}]  }
   0x1   :  { %11 = vsyncpa [#allocation3 + $0x1], 0  ;;  %s787_s15 = smov 0   ;;  %s789_s16 = smov 0  }
   0x2   :  { %s791_s17 = smov 0   ;;  %s793_s18 = smov 0  }
   0x3   :  { %s795_s19 = smov 0   ;;  %s797_s20 = smov 0  }
   0x4 LB: > { %s570_s21 = sadd.s32 4294967295, %s750_s20   ;;  %s571_s22 = sadd.s32 4294967294, %s750_s20   ;;  %s750_s20 = sphi %s797_s20, %s17_s20   ;;  %s746_s19 = sphi %s795_s19, %s939_s19   ;;  %s742_s18 = sphi %s793_s18, %s938_s18   ;;  %s738_s17 = sphi %s791_s17, %s937_s17   ;;  %s734_s16 = sphi %s789_s16, %s936_s16   ;;  %s730_s15 = sphi %s787_s15, %s935_s15  }
   0x5   : > { %s29_s23 = sadd.s32 1, %s746_s19  ;;  %s146_s24 = sadd.s32 1, %s738_s17 }
   0x6   : > { %p31_p0 = scmp.ge.s32.totalorder %s29_s23, 2  ;;  %p156_p1 = scmp.ne.s32.totalorder %s738_s17, %s734_s16 }
   0x7   : > { %p157_p2 = scmp.eq.s32.totalorder %s570_s21, 1  ;;  %p162_p3 = scmp.ne.s32.totalorder %s734_s16, %s730_s15 }
   0x8   : > { %s941_s23 = smov (%p31_p0, %s29_s23), 0  ;;  %p163_p5 = scmp.eq.s32.totalorder %s571_s22, 1 }
   0x9   : > { %p827_p4 = por %p157_p2, %p156_p1  ;;  %s141_s26 = ssub.s32 %s746_s19, %s941_s23 }
   0xa   : > { %p574_p6 = scmp.ge.s32.totalorder %s750_s20, 1  ;;  %p144_p7 = scmp.eq.s32.totalorder %s141_s26, 0 }
   0xb   : > { %p834_p8 = por %p163_p5, %p162_p3  ;;  %p217_p9 = scmp.lt.s32.totalorder %s750_s20, 3 }
   0xc   : > { %s840_s28 = scalar_select %p144_p7, %s738_s17, %s146_s24  }
   0xd   : > { %p218_p10 = pnand %p574_p6, %p217_p9 }
   0xe   : > { %p262_p11 = scmp.lt.s32.totalorder (!%p218_p10), %s742_s18, 1  ;;  %s583_s5 = sshll.u32 (!%p218_p10), %s742_s18, 3 }
   0xf   : > { %221 = sbr.rel (%p218_p10) target bundleno = 422 (0x1a6), region = 36  ;;  %s455_s8 = scalar_lea.hbm (!%p218_p10), %s932_s4, %s583_s5 }
  0x10   : > { %s692_s22 = scalar_lea.hbm (!%p218_p10), %s932_s4, 16 }
  0x14   : > { %s844_s29 = scalar_select %p262_p11, %s742_s18, 1  ;;  %v752_v2 = vmov 0   ;;  %v753_v3 = vmov 5   ;;  %v754_v4 = vmov 6   ;;  %v755_v5 = vmov 8  }
  0x15   : > { %653 = vset.pattern.permute.xlu1 %v752_v2  ;;  %657 = vset.pattern.permute.xlu0 %v753_v3  ;;  %v756_v10 = vmov 4   ;;  %v757_v15 = vmov 2   ;;  %v758_v20 = vmov 7   ;;  %v759_v27 = vmov 1  }
  0x16   : > { %s576_s30 = sshll.u32 %s844_s29, 3  ;;  %s586_s11 = sshll.u32 %s844_s29, 7  ;;  %655 = vset.pattern.permute.xlu2 %v756_v10  ;;  %v760_v30 = vmov 9   ;;  %v761_v31 = vmov 3  }
  0x17   : > { %s268_s7 = scalar_lea.vmem %s928_s0, %s576_s30  ;;  %s280_s10 = scalar_lea.vmem %s930_s2, %s576_s30 }
  0x18   : > { %v286_v0 = vld [vmem:[%s268_s7] sm:$0xff]  ;;  %s861_s14 = scalar_lea.vmem %s929_s1, %s586_s11  ;;  %s587_s21 = sshll.u32 %s844_s29, 4 }
  0x19   : > { %287 = vmax.xlane.f32.xlu0 %v286_v0  ;;  %v853_v1 = vld [vmem:[%s280_s10] sm:$0xff]  ;;  %v325_v7 = vld [vmem:[%s861_s14 + $0x78] sm:$0xff]  ;;  %v324_v8 = vld [vmem:[%s861_s14 + $0x70] sm:$0xff]  ;;  %s285_s26 = scalar_lea.vmem %s931_s3, %s587_s21  ;;  %s259_s29 = sand.u32 1, %s734_s16  }
  0x1a   : > { %351 = vperm.xlu1 %653, %v853_v1   ;;  %326 = vmatpush.msra.mxu0 %v325_v7  ;;  %v323_v11 = vld [vmem:[%s861_s14 + $0x68] sm:$0xff]  ;;  %v322_v13 = vld [vmem:[%s861_s14 + $0x60] sm:$0xff]  ;;  %v321_v14 = vld [vmem:[%s861_s14 + $0x58] sm:$0xff]  ;;  %s575_s30 = sshll.u32 %s259_s29, 3  ;;  %s459_s11 = sshll.u32 %s455_s8, 4  ;;  %s460_s11 = int_to_ptr.hbm [resolvable:$true] %s459_s11 }
  0x1b   : > { %388 = vperm.xlu2 %655, %v853_v1   ;;  %v320_v16 = vld [vmem:[%s861_s14 + $0x50] sm:$0xff]  ;;  %v319_v18 = vld [vmem:[%s861_s14 + $0x48] sm:$0xff]  ;;  %v318_v19 = vld [vmem:[%s861_s14 + $0x40] sm:$0xff]  ;;  %s261_s9 = scalar_lea.vmem [#allocation2], %s575_s30  ;;  %s444_s18 = scalar_lea.sflag [#allocation3], %s259_s29 }
  0x1c   : > { %327 = vmatpush.msra.mxu0 %v324_v8  ;;  %v317_v21 = vld [vmem:[%s861_s14 + $0x38] sm:$0xff]  ;;  %v316_v22 = vld [vmem:[%s861_s14 + $0x30] sm:$0xff]  ;;  %v315_v23 = vld [vmem:[%s861_s14 + $0x28] sm:$0xff]  ;;  %s457_s10 = sshll.u32 %s261_s9, 4  ;;  %s686_s12 = sshra.s32 %s460_s11, 4  ;;  %s458_s10 = int_to_ptr.vmem [resolvable:$true] %s457_s10  ;;  %s687_s12 = int_to_ptr.hbm [resolvable:$true] %s686_s12 }
  0x1d   : > { %v314_v24 = vld [vmem:[%s861_s14 + $0x20] sm:$0xff]  ;;  %v313_v25 = vld [vmem:[%s861_s14 + $0x18] sm:$0xff]  ;;  %v312_v26 = vld [vmem:[%s861_s14 + $0x10] sm:$0xff]  ;;  %s688_s13 = scalar_lea.hbm %s687_s12, 8  ;;  %p693_p1 = scmp.lt.s32.totalorder %s687_s12, %s932_s4 }
  0x1e   : > { %328 = vmatpush.msra.mxu0 %v323_v11  ;;  %v311_v28 = vld [vmem:[%s861_s14 + $0x8] sm:$0xff]  ;;  %v310_v29 = vld [vmem:[%s861_s14] sm:$0xff]  ;;  %p689_p12 = scmp.ne.s32.totalorder %s687_s12, %s688_s13  ;;  %p694_p2 = scmp.lt.s32.totalorder %s692_s22, %s688_s13 }
  0x1f   : > { %v347_v46 = vld [vmem:[%s285_s26] sm:$0xff]  ;;  %v348_v60 = vld [vmem:[%s285_s26 + $0x8] sm:$0xff] }
  0x20   : > { %329 = vmatpush.msra.mxu0 %v322_v13  ;;  %v391_v47 = vperm.slane %v347_v46, 4  ;;  %v385_v48 = vperm.slane %v347_v46, 6  ;;  %v399_v49 = vperm.slane %v347_v46, 7  ;;  %v405_v50 = vperm.slane %v347_v46, 5  ;;  %p690_p13 = pnand %p689_p12, %p827_p4  ;;  %p695_p3 = por %p694_p2, %p693_p1 }
  0x21   : > { %v414_v3 = vperm.slane %v348_v60, 0  ;;  %v361_v13 = vperm.slane %v347_v46, 1 }
  0x22   : > { %654 = vset.pattern.permute.xlu1 %v754_v4  ;;  %330 = vmatpush.msra.mxu0 %v321_v14  ;;  %p691_p0 = pneg %p690_p13 }
  0x23   : > { %382 = vperm.xlu1 %654, %v853_v1   ;;  %656 = vset.pattern.permute.xlu2 %v758_v20 }
  0x24   : > { %331 = vmatpush.msra.mxu0 %v320_v16  ;;  %396 = vperm.xlu2 %656, %v853_v1   ;;  %p696_p5 = pnand %p695_p3, %p691_p0 }
  0x26   : > { %332 = vmatpush.msra.mxu0 %v319_v18  ;;  %v369_v18 = vperm.slane %v347_v46, 2 }
  0x28   : > { %333 = vmatpush.msra.mxu0 %v318_v19 }
  0x2a   : > { %334 = vmatpush.msra.mxu0 %v317_v21 }
  0x2b   : > { %658 = vset.pattern.permute.xlu1 %v755_v5 }
  0x2c   : > { %411 = vperm.xlu1 %658, %v853_v1   ;;  %335 = vmatpush.msra.mxu0 %v316_v22 }
  0x2d   : > { %659 = vset.pattern.permute.xlu2 %v759_v27 }
  0x2e   : > { %336 = vmatpush.msra.mxu0 %v315_v23  ;;  %358 = vperm.xlu2 %659, %v853_v1   ;;  %v377_v23 = vperm.slane %v347_v46, 3 }
  0x30   : > { %337 = vmatpush.msra.mxu0 %v314_v24 }
  0x32   : > { %338 = vmatpush.msra.mxu0 %v313_v25 }
  0x34   : > { %660 = vset.pattern.permute.xlu1 %v757_v15  ;;  %339 = vmatpush.msra.mxu0 %v312_v26 }
  0x35   : > { %366 = vperm.xlu1 %660, %v853_v1  }
  0x36   : > { %340 = vmatpush.msra.mxu0 %v311_v28  ;;  %661 = vset.pattern.permute.xlu2 %v761_v31  ;;  %v437_v31 = vperm.slane %v348_v60, 1 }
  0x37   : > { %374 = vperm.xlu2 %661, %v853_v1  }
  0x38   : > { %341 = vmatpush.msra.mxu0 %v310_v29 }
  0x3d   : > { %662 = vset.pattern.permute.xlu1 %v760_v30 }
  0x3e   : > { %434 = vperm.xlu1 %662, %v853_v1  }
  0x75   : > { %v389_v45 = vpop.permute.xlu2 %388 }
  0x76   : > { %v392_v54 = vmax.f32 %v389_v45, %v391_v47  ;;  %v421_v61 = vmin.f32 %v389_v45, %v391_v47 }
  0x7e   : > { %v397_v53 = vpop.permute.xlu2 %396 }
  0x7f   : > { %v400_v56 = vmin.f32 %v397_v53, %v399_v49  ;;  %v423_v63 = vmax.f32 %v397_v53, %v399_v49 }
  0x88   : > { %v359_v11 = vpop.permute.xlu2 %358 }
  0x8c   : > { %v288_v6 = vpop.xlane.xlu0 %287  ;;  %v352_v44 = vpop.permute.xlu1 %351 }
  0x8d   : > { %v289_v9 = vsub.f32 %v286_v0, %v288_v6 }
  0x8f   : > { %v290_v12 = vmul.f32 1.442695, %v289_v9 }
  0x91   : > { %664 = vpow2.f32 %v290_v12  ;;  %v354_v12 = vperm.slane %v347_v46, 0  ;;  %v375_v24 = vpop.permute.xlu2 %374 }
  0x92   : > { %v378_v29 = vsub.f32 %v375_v24, %v377_v23 }
  0x93   : > { %v355_v16 = vsub.f32 %v352_v44, %v354_v12 }
  0x95   : > { %v383_v52 = vpop.permute.xlu1 %382  ;;  %v356_v20 = vand.u32 2147483647, %v355_v16 }
  0x96   : > { %v386_v55 = vmin.f32 %v383_v52, %v385_v48  ;;  %v420_v62 = vmax.f32 %v383_v52, %v385_v48 }
  0x97   : > { %v665_v17 = vpop.eup %664 }
  0x98   : > { %292 = vadd.xlane.f32.xlu0 %v665_v17  ;;  %v393_v58 = vsub.f32 %v386_v55, %v392_v54  ;;  %v422_v4 = vsub.f32 %v420_v62, %v421_v61 }
  0x9e   : > { %v412_v6 = vpop.permute.xlu1 %411 }
  0x9f   : > { %v415_v8 = vadd.f32 %v414_v3, %v412_v6 }
  0xa7   : > { %v367_v19 = vpop.permute.xlu1 %366 }
  0xa8   : > { %v370_v22 = vsub.f32 %v367_v19, %v369_v18 }
  0xaa   : > { %v371_v28 = vand.u32 2147483647, %v370_v22 }
  0xac   : > { %402 = vperm.xlu0 %657, %v853_v1   ;;  %v394_v1 = vmax.f32 %v393_v58, 0.0 }
  0xb4   : > { %663 = vset.pattern.permute.xlu0 %v760_v30 }
 0x10b   : > { %v293_v32 = vpop.xlane.xlu0 %292 }
 0x10c   : > { %666 = vrcp.f32 %v293_v32  ;;  %v305_v36 = vand.u32 2147483648, %v293_v32  ;;  %v303_v38 = vand.u32 2147483647, %v293_v32  ;;  %vm299_vm1 = vweird.f32 %v293_v32 }
 0x10e   : > { %v306_v40 = vor.u32 1.1754944e-38, %v305_v36  ;;  %vm304_vm3 = vcmp.eq.f32.partialorder %v303_v38, 8.507059e+37  ;;  %v435_v36 = vpop.permute.xlu1 %434 }
 0x112   : > { %v667_v33 = vpop.eup %666 }
 0x113   : > { %v295_v34 = vmul.f32 %v667_v33, %v293_v32  ;;  %vm300_vm0 = vweird.f32 %v667_v33 }
 0x114   : > { %vm301_vm2 = vmor %vm299_vm1, %vm300_vm0 }
 0x115   : > { %v296_v35 = vsub.f32 1.0, %v295_v34 }
 0x117   : > { %v297_v37 = vmul.f32 %v667_v33, %v296_v35  ;;  %v379_v35 = vand.u32 2147483647, %v378_v29 }
 0x119   : > { %v298_v39 = vadd.f32 %v667_v33, %v297_v37  ;;  %v438_v37 = vmul.f32 %v437_v31, %v435_v36 }
 0x11b   : > { %v302_v41 = vsel %vm301_vm2, %v667_v33, %v298_v39 }
 0x11c   : > { %v307_v42 = vsel %vm304_vm3, %v306_v40, %v302_v41 }
 0x11d   : > { %v309_v43 = vmul.f32 %v665_v17, %v307_v42  ;;  %v362_v17 = vsub.f32 %v359_v11, %v361_v13 }
 0x11e   : > { %v403_v51 = vpop.permute.xlu0 %402 }
 0x11f   : > { %342 = vmatmul.f32.vlgmr.msra.gmra.mxu0 %v309_v43  ;;  %v406_v57 = vmax.f32 %v403_v51, %v405_v50  ;;  %v424_v0 = vmin.f32 %v403_v51, %v405_v50  ;;  %v363_v21 = vand.u32 2147483647, %v362_v17 }
 0x121   : > { %v407_v59 = vsub.f32 %v400_v56, %v406_v57  ;;  %v425_v5 = vsub.f32 %v423_v63, %v424_v0  ;;  %v364_v27 = vadd.f32 %v363_v21, %v356_v20 }
 0x123   : > { %v408_v2 = vmax.f32 %v407_v59, 0.0  ;;  %v426_v9 = vmul.f32 %v425_v5, %v422_v4  ;;  %v372_v34 = vadd.f32 %v371_v28, %v364_v27 }
 0x125   : > { %v409_v7 = vmul.f32 %v408_v2, %v394_v1  ;;  %v427_v14 = vmax.f32 %v426_v9, 1e-07  ;;  %v380_v38 = vadd.f32 %v379_v35, %v372_v34 }
 0x127   : > { %v416_v10 = vsub.f32 %v415_v8, %v409_v7  ;;  %668 = vrcp.f32 %v427_v14 }
 0x129   : > { %v417_v15 = vmax.f32 %v416_v10, 1e-07  ;;  %v429_v26 = vsub.f32 %v426_v9, %v416_v10 }
 0x12b   : > { %670 = vrcp.f32 %v417_v15 }
 0x12d   : > { %v669_v25 = vpop.eup %668 }
 0x12e   : > { %v430_v33 = vmul.f32 %v669_v25, %v429_v26 }
 0x131   : > { %v671_v30 = vpop.eup %670 }
 0x132   : > { %v419_v32 = vmul.f32 %v671_v30, %v409_v7 }
 0x134   : > { %v431_v39 = vsub.f32 %v419_v32, %v430_v33 }
 0x136   : > { %v440_v43 = vmul.f32 2.0, %v431_v39 }
 0x19c   : > { %v343_v40 = vpop.f32.mrf.mxu0 }
 0x19d   : > { %v432_v41 = vadd.f32 %v380_v38, %v343_v40 }
 0x19f   : > { %v439_v42 = vadd.f32 %v438_v37, %v432_v41 }
 0x1a1   : > { %v441_v44 = vsub.f32 %v439_v42, %v440_v43 }
 0x1a3   : > { %442 = vst [vmem:[%s261_s9] sm:$0xff] %v441_v44 }
 0x1a4   : > { %699 = shalt.err (!%p696_p5)
}
 0x1a5   : > { %588 = dma.vmem_to_hbm [thread:$0]  (%p827_p4), %s458_s10, 128, %s460_s11, %s444_s18  }
 0x1a6 PF: > { %p594_p6 = scmp.ge.s32.totalorder %s750_s20, 2  ;;  %s471_s29 = sand.u32 1, %s730_s15  }
 0x1a7   : > { %s472_s30 = scalar_lea.sflag [#allocation3], %s471_s29 }
 0x1a8   : > { %p591_p7 = pnand %p594_p6, %p834_p8 }
 0x1aa   : > { %p592_p9 = pneg %p591_p7 }
 0x1ac   : > { %725 = dma.done.wait (%p592_p9), %s472_s30, 128  }
 0x1ad   : > { %727 = vsyncadd (%p592_p9), %s472_s30, 4294967168  ;;  %s17_s20 = sadd.s32 1, %s750_s20   ;;  %s935_s15 = smov %s734_s16 }
 0x1ae   : > { %p14_p10 = scmp.ge.s32.totalorder %s17_s20, 4   ;;  %s936_s16 = smov %s738_s17 }
 0x1af   : > { %s937_s17 = smov %s840_s28  ;;  %s938_s18 = smov %s746_s19 }
 0x1b0   : > { %s939_s19 = smov %s941_s23  ;;  %16 = sbr.rel (!%p14_p10) target bundleno = 4 (0x4), region = 80 }
 0x1b5   :  { %478 = vsyncpa [#allocation3], 1 }
 0x1b6   :  { %480 = vsyncpa [#allocation3 + $0x1], 1 }

</bundles_post_ra>
